<compile_context>
chip_gen: v5e
topology: v5e:2x2
jax: 0.10.0
libtpu: 0.0.40
codegen_flags: <defaults>
</compile_context>

<pallas_src>
import functools
import math

import jax
import jax.numpy as jnp
from jax import lax
from jax.experimental import pallas as pl
from jax.experimental.pallas import tpu as pltpu

_NEG_INF = -1e30                  # finite "minus infinity": no exp/−inf NaN hazards
_VMEM_LIMIT = 48 * 1024 * 1024    # within v7x 64 MiB physical; fine on v5e/v6e


# ----------------------------------------------------------------------------
# Tiled linear:  y = x @ W^T + b   (PyTorch nn.Linear weight layout)
# ----------------------------------------------------------------------------
def _linear_kernel(x_ref, w_ref, b_ref, o_ref):
    acc = jnp.dot(x_ref[...], w_ref[...], preferred_element_type=jnp.float32)
    o_ref[...] = (acc + b_ref[...]).astype(o_ref.dtype)


def linear(x, w, b, *, tm=256, tn=256):
    """x: (M, K), w: (N, K) (PyTorch layout), b: (N,) -> (M, N)."""
    M, K = x.shape
    N = w.shape[0]
    w_t = w.T                      # (K, N): kernel does a plain x @ W
    b2 = b.reshape(1, N)
    tm = min(tm, M)
    tn = min(tn, N)
    # TODO(synk): pad/mask ragged row/col tiles; demo + typical model dims divide.
    assert M % tm == 0 and N % tn == 0, (M, N, tm, tn)
    return pl.pallas_call(
        _linear_kernel,
        out_shape=jax.ShapeDtypeStruct((M, N), x.dtype),
        grid=(M // tm, N // tn),
        in_specs=[
            pl.BlockSpec((tm, K), lambda i, j: (i, 0)),
            pl.BlockSpec((K, tn), lambda i, j: (0, j)),
            pl.BlockSpec((1, tn), lambda i, j: (0, j)),
        ],
        out_specs=pl.BlockSpec((tm, tn), lambda i, j: (i, j)),
        compiler_params=pltpu.CompilerParams(
            dimension_semantics=("parallel", "parallel"),
            vmem_limit_bytes=_VMEM_LIMIT),
    )(x, w_t, b2)


# ----------------------------------------------------------------------------
# Flash attention (causal, online softmax) over layout (B, H, S, d_head)
# ----------------------------------------------------------------------------
def _flash_kernel(q_ref, k_ref, v_ref, o_ref, m_sc, l_sc, acc_sc,
                  *, scale, tq, tk):
    qi = pl.program_id(2)
    ki = pl.program_id(3)

    @pl.when(ki == 0)
    def _init():
        m_sc[...] = jnp.full_like(m_sc, _NEG_INF)
        l_sc[...] = jnp.zeros_like(l_sc)
        acc_sc[...] = jnp.zeros_like(acc_sc)

    # Causal: skip KV tiles that lie entirely above the diagonal.
    @pl.when(ki * tk < (qi + 1) * tq)
    def _compute():
        q = q_ref[0, 0] * scale            # fold 1/sqrt(dh) into the small q tile
        k = k_ref[0, 0]
        v = v_ref[0, 0]
        # q @ k^T without materializing a transpose (contract last dims).
        s = lax.dot_general(q, k, (((1,), (1,)), ((), ())),
                            preferred_element_type=jnp.float32)   # (tq, tk) f32

        # Per-tile causal mask built from global indices (finite negative).
        row = qi * tq + lax.broadcasted_iota(jnp.int32, (tq, tk), 0)
        col = ki * tk + lax.broadcasted_iota(jnp.int32, (tq, tk), 1)
        s = jnp.where(row >= col, s, _NEG_INF)

        m_prev = m_sc[...]
        m_new = jnp.maximum(m_prev, jnp.max(s, axis=-1, keepdims=True))
        alpha = jnp.exp(m_prev - m_new)
        p = jnp.exp(s - m_new)
        l_sc[...] = alpha * l_sc[...] + jnp.sum(p, axis=-1, keepdims=True)
        acc_sc[...] = alpha * acc_sc[...] + jnp.dot(
            p.astype(v.dtype), v, preferred_element_type=jnp.float32)
        m_sc[...] = m_new

    @pl.when(ki == pl.num_programs(3) - 1)
    def _finalize():
        inv_l = pl.reciprocal(l_sc[...], approx=True)   # EUP slot, ~free next to MXU
        o_ref[0, 0] = (acc_sc[...] * inv_l).astype(o_ref.dtype)


def flash_attention(q, k, v, *, scale, tile_q=128, tile_k=128):
    """q, k, v: (B, H, S, d_head) -> (B, H, S, d_head) causal attention."""
    B, H, S, dh = q.shape
    tq = min(tile_q, S)
    tk = min(tile_k, S)
    # TODO(synk): pad/mask ragged sequence tiles for S not divisible by the tile.
    assert S % tq == 0 and S % tk == 0, (S, tq, tk)
    kernel = functools.partial(_flash_kernel, scale=scale, tq=tq, tk=tk)
    return pl.pallas_call(
        kernel,
        out_shape=jax.ShapeDtypeStruct((B, H, S, dh), q.dtype),
        grid=(B, H, S // tq, S // tk),
        in_specs=[
            pl.BlockSpec((1, 1, tq, dh), lambda b, h, qi, ki: (b, h, qi, 0)),
            pl.BlockSpec((1, 1, tk, dh), lambda b, h, qi, ki: (b, h, ki, 0)),
            pl.BlockSpec((1, 1, tk, dh), lambda b, h, qi, ki: (b, h, ki, 0)),
        ],
        out_specs=pl.BlockSpec((1, 1, tq, dh), lambda b, h, qi, ki: (b, h, qi, 0)),
        scratch_shapes=[
            pltpu.VMEM((tq, 1), jnp.float32),    # running max  m
            pltpu.VMEM((tq, 1), jnp.float32),    # running sum  l
            pltpu.VMEM((tq, dh), jnp.float32),   # un-normalized output accumulator
        ],
        compiler_params=pltpu.CompilerParams(
            dimension_semantics=("parallel", "parallel", "parallel", "arbitrary"),
            vmem_limit_bytes=_VMEM_LIMIT),
    )(q, k, v)


# ----------------------------------------------------------------------------
# Full module forward
# ----------------------------------------------------------------------------
def attention_forward(x, w_qkv, b_qkv, w_out, b_out, *, n_heads):
    """x: (B, S, D). w_qkv: (3D, D), w_out: (D, D) (PyTorch nn.Linear layout)."""
    B, S, D = x.shape
    d_head = D // n_heads
    assert d_head * n_heads == D

    # Fused QKV projection (Pallas tiled matmul).
    qkv = linear(x.reshape(B * S, D), w_qkv, b_qkv)              # (B*S, 3D)

    # 'b s (three h dh)' -> three tensors of (B, H, S, dh): layout plumbing only.
    qkv = qkv.reshape(B, S, 3, n_heads, d_head)
    q = qkv[:, :, 0].transpose(0, 2, 1, 3)
    k = qkv[:, :, 1].transpose(0, 2, 1, 3)
    v = qkv[:, :, 2].transpose(0, 2, 1, 3)

    ctx = flash_attention(q, k, v, scale=1.0 / math.sqrt(d_head))  # (B, H, S, dh)

    # 'b h s dh -> b s (h dh)' then output projection.
    ctx = ctx.transpose(0, 2, 1, 3).reshape(B * S, D)
    out = linear(ctx, w_out, b_out)
    return out.reshape(B, S, D)


def attention_reference(x, w_qkv, b_qkv, w_out, b_out, *, n_heads):
    """Pure-JAX reference matching the PyTorch forward exactly."""
    B, S, D = x.shape
    d_head = D // n_heads
    qkv = x @ w_qkv.T + b_qkv                                    # (B, S, 3D)
    qkv = qkv.reshape(B, S, 3, n_heads, d_head).transpose(2, 0, 3, 1, 4)
    q, k, v = qkv[0], qkv[1], qkv[2]                             # (B, H, S, dh)
    scale = 1.0 / math.sqrt(d_head)
    scores = jnp.einsum("bhqd,bhkd->bhqk", q, k) * scale
    mask = jnp.tril(jnp.ones((S, S), dtype=bool))
    scores = jnp.where(mask, scores, -jnp.inf)
    p = jax.nn.softmax(scores, axis=-1)
    o = jnp.einsum("bhqk,bhkd->bhqd", p, v)                      # (B, H, S, dh)
    o = o.transpose(0, 2, 1, 3).reshape(B, S, D)
    return o @ w_out.T + b_out


if __name__ == "__main__":
    B, S, D, H = 2, 8, 32, 4
    key = jax.random.PRNGKey(0)
    k_x, k_wqkv, k_bqkv, k_wout, k_bout = jax.random.split(key, 5)

    # Deterministic parameter init (uniform ~ PyTorch nn.Linear scale 1/sqrt(fan_in)).
    bound = 1.0 / math.sqrt(D)
    x = jax.random.normal(k_x, (B, S, D), dtype=jnp.float32)
    w_qkv = jax.random.uniform(k_wqkv, (3 * D, D), jnp.float32, -bound, bound)
    b_qkv = jax.random.uniform(k_bqkv, (3 * D,), jnp.float32, -bound, bound)
    w_out = jax.random.uniform(k_wout, (D, D), jnp.float32, -bound, bound)
    b_out = jax.random.uniform(k_bout, (D,), jnp.float32, -bound, bound)

    fwd = jax.jit(functools.partial(attention_forward, n_heads=H))
    out = jax.block_until_ready(fwd(x, w_qkv, b_qkv, w_out, b_out))

    ref = attention_reference(x, w_qkv, b_qkv, w_out, b_out, n_heads=H)
    assert out.shape == (B, S, D)
    max_err = float(jnp.max(jnp.abs(out - ref)))
    # Tolerance leaves headroom for the EUP approximate reciprocal.
    assert jnp.allclose(out, ref, atol=5e-3, rtol=5e-3), f"mismatch: {max_err}"

    print("KERNEL_OK")
</pallas_src>

<mosaic_0001>
module attributes {stable_mosaic.version = 11 : i64} {
  func.func @_linear_kernel(%arg0: i32, %arg1: i32, %arg2: memref<16x32xf32, #tpu.memory_space<vmem>>, %arg3: memref<32x96xf32, #tpu.memory_space<vmem>>, %arg4: memref<1x96xf32, #tpu.memory_space<vmem>>, %arg5: memref<16x96xf32, #tpu.memory_space<vmem>>) attributes {dimension_semantics = [#tpu.dimension_semantics<parallel>, #tpu.dimension_semantics<parallel>], iteration_bounds = array<i64: 1, 1>, scalar_prefetch = 0 : i64, scratch_operands = 0 : i64, tpu.core_type = #tpu.core_type<tc>, window_params = [{transform_indices = @transform_0, window_bounds = array<i64: 16, 32>}, {transform_indices = @transform_1, window_bounds = array<i64: 32, 96>}, {transform_indices = @transform_2, window_bounds = array<i64: 1, 96>}, {transform_indices = @transform_3, window_bounds = array<i64: 16, 96>}]} {
    %c0 = arith.constant 0 : index
    %c0_0 = arith.constant 0 : index
    %0 = vector.load %arg2[%c0, %c0_0] : memref<16x32xf32, #tpu.memory_space<vmem>>, vector<16x32xf32>
    %c0_1 = arith.constant 0 : index
    %c0_2 = arith.constant 0 : index
    %1 = vector.load %arg3[%c0_1, %c0_2] : memref<32x96xf32, #tpu.memory_space<vmem>>, vector<32x96xf32>
    %cst = arith.constant dense<0.000000e+00> : vector<16x96xf32>
    %2 = tpu.matmul %0, %1, %cst {dimension_numbers = #tpu.dot_dimension_numbers<[1], [0], [0], [1], [0, 0, 1, 1], [], []>} : vector<16x32xf32>, vector<32x96xf32>, vector<16x96xf32> -> vector<16x96xf32>
    %c0_3 = arith.constant 0 : index
    %c0_4 = arith.constant 0 : index
    %3 = vector.load %arg4[%c0_3, %c0_4] : memref<1x96xf32, #tpu.memory_space<vmem>>, vector<1x96xf32>
    %4 = vector.broadcast %3 : vector<1x96xf32> to vector<16x96xf32>
    %5 = arith.addf %2, %4 : vector<16x96xf32>
    %c0_5 = arith.constant 0 : index
    %c0_6 = arith.constant 0 : index
    %6 = vector.load %arg5[%c0_5, %c0_6] : memref<16x96xf32, #tpu.memory_space<vmem>>, vector<16x96xf32>
    tpu.vector_store %arg5[%c0_5, %c0_6], %5 {strides = array<i32>} : memref<16x96xf32, #tpu.memory_space<vmem>>, vector<16x96xf32>,
    return
  }
  func.func @transform_0(%arg0: i32, %arg1: i32) -> (i32, i32) {
    %c0_i32 = arith.constant 0 : i32
    %c0_i32_0 = arith.constant 0 : i32
    return %arg0, %c0_i32 : i32, i32
  }
  func.func @transform_1(%arg0: i32, %arg1: i32) -> (i32, i32) {
    %c0_i32 = arith.constant 0 : i32
    %c0_i32_0 = arith.constant 0 : i32
    return %c0_i32, %arg1 : i32, i32
  }
  func.func @transform_2(%arg0: i32, %arg1: i32) -> (i32, i32) {
    %c0_i32 = arith.constant 0 : i32
    %c0_i32_0 = arith.constant 0 : i32
    return %c0_i32, %arg1 : i32, i32
  }
  func.func @transform_3(%arg0: i32, %arg1: i32) -> (i32, i32) {
    %c0_i32 = arith.constant 0 : i32
    return %arg0, %arg1 : i32, i32
  }
}

module attributes {stable_mosaic.version = 11 : i64} {
  func.func @_linear_kernel(%arg0: i32, %arg1: i32, %arg2: memref<16x32xf32, #tpu.memory_space<vmem>>, %arg3: memref<32x32xf32, #tpu.memory_space<vmem>>, %arg4: memref<1x32xf32, #tpu.memory_space<vmem>>, %arg5: memref<16x32xf32, #tpu.memory_space<vmem>>) attributes {dimension_semantics = [#tpu.dimension_semantics<parallel>, #tpu.dimension_semantics<parallel>], iteration_bounds = array<i64: 1, 1>, scalar_prefetch = 0 : i64, scratch_operands = 0 : i64, tpu.core_type = #tpu.core_type<tc>, window_params = [{transform_indices = @transform_0, window_bounds = array<i64: 16, 32>}, {transform_indices = @transform_1, window_bounds = array<i64: 32, 32>}, {transform_indices = @transform_2, window_bounds = array<i64: 1, 32>}, {transform_indices = @transform_3, window_bounds = array<i64: 16, 32>}]} {
    %c0 = arith.constant 0 : index
    %c0_0 = arith.constant 0 : index
    %0 = vector.load %arg2[%c0, %c0_0] : memref<16x32xf32, #tpu.memory_space<vmem>>, vector<16x32xf32>
    %c0_1 = arith.constant 0 : index
    %c0_2 = arith.constant 0 : index
    %1 = vector.load %arg3[%c0_1, %c0_2] : memref<32x32xf32, #tpu.memory_space<vmem>>, vector<32x32xf32>
    %cst = arith.constant dense<0.000000e+00> : vector<16x32xf32>
    %2 = tpu.matmul %0, %1, %cst {dimension_numbers = #tpu.dot_dimension_numbers<[1], [0], [0], [1], [0, 0, 1, 1], [], []>} : vector<16x32xf32>, vector<32x32xf32>, vector<16x32xf32> -> vector<16x32xf32>
    %c0_3 = arith.constant 0 : index
    %c0_4 = arith.constant 0 : index
    %3 = vector.load %arg4[%c0_3, %c0_4] : memref<1x32xf32, #tpu.memory_space<vmem>>, vector<1x32xf32>
    %4 = vector.broadcast %3 : vector<1x32xf32> to vector<16x32xf32>
    %5 = arith.addf %2, %4 : vector<16x32xf32>
    %c0_5 = arith.constant 0 : index
    %c0_6 = arith.constant 0 : index
    %6 = vector.load %arg5[%c0_5, %c0_6] : memref<16x32xf32, #tpu.memory_space<vmem>>, vector<16x32xf32>
    tpu.vector_store %arg5[%c0_5, %c0_6], %5 {strides = array<i32>} : memref<16x32xf32, #tpu.memory_space<vmem>>, vector<16x32xf32>,
    return
  }
  func.func @transform_0(%arg0: i32, %arg1: i32) -> (i32, i32) {
    %c0_i32 = arith.constant 0 : i32
    %c0_i32_0 = arith.constant 0 : i32
    return %arg0, %c0_i32 : i32, i32
  }
  func.func @transform_1(%arg0: i32, %arg1: i32) -> (i32, i32) {
    %c0_i32 = arith.constant 0 : i32
    %c0_i32_0 = arith.constant 0 : i32
    return %c0_i32, %arg1 : i32, i32
  }
  func.func @transform_2(%arg0: i32, %arg1: i32) -> (i32, i32) {
    %c0_i32 = arith.constant 0 : i32
    %c0_i32_0 = arith.constant 0 : i32
    return %c0_i32, %arg1 : i32, i32
  }
  func.func @transform_3(%arg0: i32, %arg1: i32) -> (i32, i32) {
    %c0_i32 = arith.constant 0 : i32
    return %arg0, %arg1 : i32, i32
  }
}

module attributes {stable_mosaic.version = 11 : i64} {
  func.func @_flash_kernel(%arg0: i32, %arg1: i32, %arg2: i32, %arg3: i32, %arg4: memref<1x1x8x8xf32, #tpu.memory_space<vmem>>, %arg5: memref<1x1x8x8xf32, #tpu.memory_space<vmem>>, %arg6: memref<1x1x8x8xf32, #tpu.memory_space<vmem>>, %arg7: memref<1x1x8x8xf32, #tpu.memory_space<vmem>>, %arg8: memref<8x1xf32, #tpu.memory_space<vmem>>, %arg9: memref<8x1xf32, #tpu.memory_space<vmem>>, %arg10: memref<8x8xf32, #tpu.memory_space<vmem>>) attributes {dimension_semantics = [#tpu.dimension_semantics<parallel>, #tpu.dimension_semantics<parallel>, #tpu.dimension_semantics<parallel>, #tpu.dimension_semantics<arbitrary>], iteration_bounds = array<i64: 2, 4, 1, 1>, scalar_prefetch = 0 : i64, scratch_operands = 3 : i64, tpu.core_type = #tpu.core_type<tc>, window_params = [{transform_indices = @transform_0, window_bounds = array<i64: 1, 1, 8, 8>}, {transform_indices = @transform_1, window_bounds = array<i64: 1, 1, 8, 8>}, {transform_indices = @transform_2, window_bounds = array<i64: 1, 1, 8, 8>}, {transform_indices = @transform_3, window_bounds = array<i64: 1, 1, 8, 8>}]} {
    %c0_i32 = arith.constant 0 : i32
    %0 = arith.cmpi eq, %arg3, %c0_i32 : i32
    %1 = arith.extui %0 : i1 to i32
    %c0_i32_0 = arith.constant 0 : i32
    %2 = arith.cmpi ne, %1, %c0_i32_0 : i32
    scf.if %2 {
      %cst = arith.constant -1.000000e+30 : f32
      %12 = vector.broadcast %cst : f32 to vector<8x1xf32>
      %c0 = arith.constant 0 : index
      %c0_5 = arith.constant 0 : index
      %13 = vector.load %arg8[%c0, %c0_5] : memref<8x1xf32, #tpu.memory_space<vmem>>, vector<8x1xf32>
      tpu.vector_store %arg8[%c0, %c0_5], %12 {strides = array<i32>} : memref<8x1xf32, #tpu.memory_space<vmem>>, vector<8x1xf32>,
      %cst_6 = arith.constant 0.000000e+00 : f32
      %14 = vector.broadcast %cst_6 : f32 to vector<8x1xf32>
      %c0_7 = arith.constant 0 : index
      %c0_8 = arith.constant 0 : index
      %15 = vector.load %arg9[%c0_7, %c0_8] : memref<8x1xf32, #tpu.memory_space<vmem>>, vector<8x1xf32>
      tpu.vector_store %arg9[%c0_7, %c0_8], %14 {strides = array<i32>} : memref<8x1xf32, #tpu.memory_space<vmem>>, vector<8x1xf32>,
      %cst_9 = arith.constant 0.000000e+00 : f32
      %16 = vector.broadcast %cst_9 : f32 to vector<8x8xf32>
      %c0_10 = arith.constant 0 : index
      %c0_11 = arith.constant 0 : index
      %17 = vector.load %arg10[%c0_10, %c0_11] : memref<8x8xf32, #tpu.memory_space<vmem>>, vector<8x8xf32>
      tpu.vector_store %arg10[%c0_10, %c0_11], %16 {strides = array<i32>} : memref<8x8xf32, #tpu.memory_space<vmem>>, vector<8x8xf32>,
    } else {
    }
    %c8_i32 = arith.constant 8 : i32
    %3 = arith.muli %arg3, %c8_i32 : i32
    %c1_i32 = arith.constant 1 : i32
    %4 = arith.addi %arg2, %c1_i32 : i32
    %c8_i32_1 = arith.constant 8 : i32
    %5 = arith.muli %4, %c8_i32_1 : i32
    %6 = arith.cmpi slt, %3, %5 : i32
    %7 = arith.extui %6 : i1 to i32
    %c0_i32_2 = arith.constant 0 : i32
    %8 = arith.cmpi ne, %7, %c0_i32_2 : i32
    scf.if %8 {
      %c0 = arith.constant 0 : index
      %c0_5 = arith.constant 0 : index
      %c0_6 = arith.constant 0 : index
      %c0_7 = arith.constant 0 : index
      %12 = vector.load %arg4[%c0, %c0_5, %c0_6, %c0_7] : memref<1x1x8x8xf32, #tpu.memory_space<vmem>>, vector<1x1x8x8xf32>
      %13 = vector.shape_cast %12 : vector<1x1x8x8xf32> to vector<8x8xf32>
      %cst = arith.constant 0.353553385 : f32
      %14 = vector.broadcast %cst : f32 to vector<8x8xf32>
      %15 = arith.mulf %13, %14 : vector<8x8xf32>
      %c0_8 = arith.constant 0 : index
      %c0_9 = arith.constant 0 : index
      %c0_10 = arith.constant 0 : index
      %c0_11 = arith.constant 0 : index
      %16 = vector.load %arg5[%c0_8, %c0_9, %c0_10, %c0_11] : memref<1x1x8x8xf32, #tpu.memory_space<vmem>>, vector<1x1x8x8xf32>
      %17 = vector.shape_cast %16 : vector<1x1x8x8xf32> to vector<8x8xf32>
      %c0_12 = arith.constant 0 : index
      %c0_13 = arith.constant 0 : index
      %c0_14 = arith.constant 0 : index
      %c0_15 = arith.constant 0 : index
      %18 = vector.load %arg6[%c0_12, %c0_13, %c0_14, %c0_15] : memref<1x1x8x8xf32, #tpu.memory_space<vmem>>, vector<1x1x8x8xf32>
      %19 = vector.shape_cast %18 : vector<1x1x8x8xf32> to vector<8x8xf32>
      %cst_16 = arith.constant dense<0.000000e+00> : vector<8x8xf32>
      %20 = tpu.matmul %15, %17, %cst_16 {dimension_numbers = #tpu.dot_dimension_numbers<[1], [1], [0], [0], [0, 0, 1, 0], [], []>} : vector<8x8xf32>, vector<8x8xf32>, vector<8x8xf32> -> vector<8x8xf32>
      %c8_i32_17 = arith.constant 8 : i32
      %21 = arith.muli %arg2, %c8_i32_17 : i32
      %22 = tpu.iota {dimensions = array<i32: 0>} : vector<8x8xi32>
      %23 = vector.broadcast %21 : i32 to vector<8x8xi32>
      %24 = arith.addi %23, %22 : vector<8x8xi32>
      %c8_i32_18 = arith.constant 8 : i32
      %25 = arith.muli %arg3, %c8_i32_18 : i32
      %26 = tpu.iota {dimensions = array<i32: 1>} : vector<8x8xi32>
      %27 = vector.broadcast %25 : i32 to vector<8x8xi32>
      %28 = arith.addi %27, %26 : vector<8x8xi32>
      %29 = arith.cmpi sge, %24, %28 : vector<8x8xi32>
      %cst_19 = arith.constant -1.000000e+30 : f32
      %30 = vector.broadcast %cst_19 : f32 to vector<8x8xf32>
      %31 = arith.select %29, %20, %30 : vector<8x8xi1>, vector<8x8xf32>
      %c0_20 = arith.constant 0 : index
      %c0_21 = arith.constant 0 : index
      %32 = vector.load %arg8[%c0_20, %c0_21] : memref<8x1xf32, #tpu.memory_space<vmem>>, vector<8x1xf32>
      %cst_22 = arith.constant dense<0xFF800000> : vector<8xf32>
      %33 = vector.multi_reduction <maximumf>, %31, %cst_22 [1] : vector<8x8xf32> to vector<8xf32>
      %34 = vector.shape_cast %33 : vector<8xf32> to vector<8x1xf32>
      %35 = arith.maximumf %32, %34 : vector<8x1xf32>
      %36 = arith.subf %32, %35 : vector<8x1xf32>
      %37 = math.exp %36 : vector<8x1xf32>
      %38 = vector.broadcast %35 : vector<8x1xf32> to vector<8x8xf32>
      %39 = arith.subf %31, %38 : vector<8x8xf32>
      %40 = math.exp %39 : vector<8x8xf32>
      %c0_23 = arith.constant 0 : index
      %c0_24 = arith.constant 0 : index
      %41 = vector.load %arg9[%c0_23, %c0_24] : memref<8x1xf32, #tpu.memory_space<vmem>>, vector<8x1xf32>
      %42 = arith.mulf %37, %41 : vector<8x1xf32>
      %cst_25 = arith.constant dense<0.000000e+00> : vector<8xf32>
      %43 = vector.multi_reduction <add>, %40, %cst_25 [1] : vector<8x8xf32> to vector<8xf32>
      %44 = vector.shape_cast %43 : vector<8xf32> to vector<8x1xf32>
      %45 = arith.addf %42, %44 : vector<8x1xf32>
      %c0_26 = arith.constant 0 : index
      %c0_27 = arith.constant 0 : index
      %46 = vector.load %arg9[%c0_26, %c0_27] : memref<8x1xf32, #tpu.memory_space<vmem>>, vector<8x1xf32>
      tpu.vector_store %arg9[%c0_26, %c0_27], %45 {strides = array<i32>} : memref<8x1xf32, #tpu.memory_space<vmem>>, vector<8x1xf32>,
      %c0_28 = arith.constant 0 : index
      %c0_29 = arith.constant 0 : index
      %47 = vector.load %arg10[%c0_28, %c0_29] : memref<8x8xf32, #tpu.memory_space<vmem>>, vector<8x8xf32>
      %48 = vector.broadcast %37 : vector<8x1xf32> to vector<8x8xf32>
      %49 = arith.mulf %48, %47 : vector<8x8xf32>
      %cst_30 = arith.constant dense<0.000000e+00> : vector<8x8xf32>
      %50 = tpu.matmul %40, %19, %cst_30 {dimension_numbers = #tpu.dot_dimension_numbers<[1], [0], [0], [1], [0, 0, 1, 1], [], []>} : vector<8x8xf32>, vector<8x8xf32>, vector<8x8xf32> -> vector<8x8xf32>
      %51 = arith.addf %49, %50 : vector<8x8xf32>
      %c0_31 = arith.constant 0 : index
      %c0_32 = arith.constant 0 : index
      %52 = vector.load %arg10[%c0_31, %c0_32] : memref<8x8xf32, #tpu.memory_space<vmem>>, vector<8x8xf32>
      tpu.vector_store %arg10[%c0_31, %c0_32], %51 {strides = array<i32>} : memref<8x8xf32, #tpu.memory_space<vmem>>, vector<8x8xf32>,
      %c0_33 = arith.constant 0 : index
      %c0_34 = arith.constant 0 : index
      %53 = vector.load %arg8[%c0_33, %c0_34] : memref<8x1xf32, #tpu.memory_space<vmem>>, vector<8x1xf32>
      tpu.vector_store %arg8[%c0_33, %c0_34], %35 {strides = array<i32>} : memref<8x1xf32, #tpu.memory_space<vmem>>, vector<8x1xf32>,
    } else {
    }
    %c0_i32_3 = arith.constant 0 : i32
    %9 = arith.cmpi eq, %arg3, %c0_i32_3 : i32
    %10 = arith.extui %9 : i1 to i32
    %c0_i32_4 = arith.constant 0 : i32
    %11 = arith.cmpi ne, %10, %c0_i32_4 : i32
    scf.if %11 {
      %c0 = arith.constant 0 : index
      %c0_5 = arith.constant 0 : index
      %12 = vector.load %arg9[%c0, %c0_5] : memref<8x1xf32, #tpu.memory_space<vmem>>, vector<8x1xf32>
      %13 = tpu.reciprocal %12 {approx = true} : vector<8x1xf32> -> vector<8x1xf32>
      %c0_6 = arith.constant 0 : index
      %c0_7 = arith.constant 0 : index
      %14 = vector.load %arg10[%c0_6, %c0_7] : memref<8x8xf32, #tpu.memory_space<vmem>>, vector<8x8xf32>
      %15 = vector.broadcast %13 : vector<8x1xf32> to vector<8x8xf32>
      %16 = arith.mulf %14, %15 : vector<8x8xf32>
      %c0_8 = arith.constant 0 : index
      %c0_9 = arith.constant 0 : index
      %c0_10 = arith.constant 0 : index
      %c0_11 = arith.constant 0 : index
      %17 = vector.load %arg7[%c0_8, %c0_9, %c0_10, %c0_11] : memref<1x1x8x8xf32, #tpu.memory_space<vmem>>, vector<1x1x8x8xf32>
      %18 = vector.shape_cast %17 : vector<1x1x8x8xf32> to vector<8x8xf32>
      %19 = vector.shape_cast %16 : vector<8x8xf32> to vector<1x1x8x8xf32>
      tpu.vector_store %arg7[%c0_8, %c0_9, %c0_10, %c0_11], %19 {strides = array<i32>} : memref<1x1x8x8xf32, #tpu.memory_space<vmem>>, vector<1x1x8x8xf32>,
    } else {
    }
    return
  }
  func.func @transform_0(%arg0: i32, %arg1: i32, %arg2: i32, %arg3: i32) -> (i32, i32, i32, i32) {
    %c0_i32 = arith.constant 0 : i32
    %c0_i32_0 = arith.constant 0 : i32
    return %arg0, %arg1, %arg2, %c0_i32 : i32, i32, i32, i32
  }
  func.func @transform_1(%arg0: i32, %arg1: i32, %arg2: i32, %arg3: i32) -> (i32, i32, i32, i32) {
    %c0_i32 = arith.constant 0 : i32
    %c0_i32_0 = arith.constant 0 : i32
    return %arg0, %arg1, %arg3, %c0_i32 : i32, i32, i32, i32
  }
  func.func @transform_2(%arg0: i32, %arg1: i32, %arg2: i32, %arg3: i32) -> (i32, i32, i32, i32) {
    %c0_i32 = arith.constant 0 : i32
    %c0_i32_0 = arith.constant 0 : i32
    return %arg0, %arg1, %arg3, %c0_i32 : i32, i32, i32, i32
  }
  func.func @transform_3(%arg0: i32, %arg1: i32, %arg2: i32, %arg3: i32) -> (i32, i32, i32, i32) {
    %c0_i32 = arith.constant 0 : i32
    %c0_i32_0 = arith.constant 0 : i32
    return %arg0, %arg1, %arg2, %c0_i32 : i32, i32, i32, i32
  }
}

</mosaic_0001>

<bundles_post_ra>
// kernel: attention_forward.5
= control target key start
LH: loop header
LB: loop body
LE: loop exit
PB: predicated region body
PF: predicated region fallthrough
CT: control target
= control target key end

     0   :  { %s162_s0 = inlined_call_operand.vmem [shape: f32[16,32], index: 0, kind: input, shape index: {}]   ;;  %s163_s1 = inlined_call_operand.vmem [shape: f32[32,32], index: 1, kind: input, shape index: {}]   ;;  %s164_s2 = inlined_call_operand.vmem [shape: f32[1,32], index: 2, kind: input, shape index: {}]   ;;  %s165_s3 = inlined_call_operand.hbm [shape: f32[16,32], index: 3, kind: output, shape index: {}]  }
   0x1   :  { %v20_v0 = vld [vmem:[%s163_s1 + $0x18] sm:$0xff]  ;;  %v19_v1 = vld [vmem:[%s163_s1 + $0x10] sm:$0xff]  ;;  %v18_v2 = vld [vmem:[%s163_s1 + $0x8] sm:$0xff] }
   0x2   :  { %44 = vmatpush.msra.mxu0 %v20_v0  ;;  %77 = vmatpush.msra.mxu1 %v20_v0 }
   0x3   :  { %8 = vsyncpa [#allocation3], 0  ;;  %v17_v3 = vld [vmem:[%s163_s1] sm:$0xff]  ;;  %vm25_vm0 = vcmask 261120   ;;  %v16_v5 = vld [vmem:[%s162_s0 + $0x8] sm:$0xff]  ;;  %s111_s1 = smov [#allocation2]  }
   0x4   :  { %45 = vmatpush.msra.mxu0 %v19_v1  ;;  %78 = vmatpush.msra.mxu1 %v19_v1  ;;  %v15_v4 = vld [vmem:[%s162_s0] sm:$0xff]  ;;  %s61_s26 = sshll.u32 %s111_s1, 4  ;;  %s63_s29 = sshll.u32 %s165_s3, 4  ;;  %s62_s26 = int_to_ptr.vmem [resolvable:$true] %s61_s26  ;;  %s64_s29 = int_to_ptr.hbm [resolvable:$true] %s63_s29 }
   0x5   :  { %v84_v6 = vld [vmem:[%s164_s2] ss:$0 sm:$0xff]  ;;  %s112_s0 = smov 128   ;;  %s113_s30 = smov 8  }
   0x6   :  { %46 = vmatpush.msra.mxu0 %v18_v2  ;;  %79 = vmatpush.msra.mxu1 %v18_v2 }
   0x8   :  { %47 = vmatpush.msra.mxu0 %v17_v3  ;;  %80 = vmatpush.msra.mxu1 %v17_v3 }
   0x9   :  { %75 = vmatmul.msk.f32.vlgmr.msra.gmra.mxu0 %vm25_vm0, %v15_v4  ;;  %76 = vmatmul.msk.f32.vlgmr.msra.gmra.mxu1 %vm25_vm0, %v16_v5 }
  0x86   :  { %v49_v7 = vpop.f32.mrf.mxu0  ;;  %v52_v8 = vpop.f32.mrf.mxu1 }
  0x87   :  { %v50_v9 = vadd.f32 %v84_v6, %v49_v7  ;;  %v53_v10 = vadd.f32 %v84_v6, %v52_v8 }
  0x89   :  { %55 = vst.msk [vmem:[#allocation2] sm:$0xff] %vm25_vm0, %v50_v9 }
  0x8a   :  { %56 = vst.msk [vmem:[#allocation2 + $0x8] sm:$0xff] %vm25_vm0, %v53_v10 }
  0x8b   :  { %69 = dma.vmem_to_hbm [thread:$0]  %s62_s26, 256, %s64_s29, [#allocation3], %s112_s0, %s112_s0, %s113_s30  }
  0x8c   :  { %109 = dma.done.wait [#allocation3], 256  }
  0x8d   :  { %110 = vsyncadd [#allocation3], 4294967040 }
  0x8e   :  { %74 = vsyncpa [#allocation3], 1 }

// kernel: attention_forward.3
= control target key start
LH: loop header
LB: loop body
LE: loop exit
PB: predicated region body
PF: predicated region fallthrough
CT: control target
= control target key end

     0   :  { %8 = vsyncpa [#allocation3], 0  ;;  %s197_s0 = inlined_call_operand.hbm [shape: f32[16,32], index: 0, kind: input, shape index: {}]   ;;  %s198_s1 = inlined_call_operand.hbm [shape: f32[32,96], index: 1, kind: input, shape index: {}]   ;;  %s199_s2 = inlined_call_operand.vmem [shape: f32[1,96], index: 2, kind: input, shape index: {}]   ;;  %s200_s3 = inlined_call_operand.vmem [shape: f32[16,96], index: 3, kind: output, shape index: {}]  }
   0x1   :  { %s14_s14 = sshll.u32 %s197_s0, 4  ;;  %s15_s14 = int_to_ptr.hbm [resolvable:$true] %s14_s14 }
   0x2   :  { %9 = vsyncpa [#allocation5], 0  ;;  %s158_s15 = smov [#allocation2]   ;;  %s27_s19 = sshll.u32 %s198_s1, 4  ;;  %s28_s19 = int_to_ptr.hbm [resolvable:$true] %s27_s19 }
   0x3   :  { %s16_s16 = sshll.u32 %s158_s15, 4  ;;  %s159_s20 = smov 128   ;;  %s17_s16 = int_to_ptr.vmem [resolvable:$true] %s16_s16 }
   0x4   :  { %s160_s21 = smov 8   ;;  %s161_s22 = smov [#allocation4]  }
   0x5   :  { %22 = dma.hbm_to_vmem [thread:$0]  %s15_s14, 256, %s17_s16, [#allocation3], %s159_s20, %s159_s20, %s160_s21  }
   0x6   :  { %s29_s23 = sshll.u32 %s161_s22, 4  ;;  %s30_s23 = int_to_ptr.vmem [resolvable:$true] %s29_s23 }
   0x7   :  { %35 = dma.hbm_to_vmem [thread:$0]  %s28_s19, 512, %s30_s23, [#allocation5], %s159_s20, %s159_s20, %s160_s21  }
   0x8   :  { %154 = dma.done.wait [#allocation3], 256  }
   0x9   :  { %155 = vsyncadd [#allocation3], 4294967040 }
   0xa   :  { %156 = dma.done.wait [#allocation5], 512  }
   0xb   :  { %157 = vsyncadd [#allocation5], 4294966784  ;;  %v51_v0 = vld [vmem:[#allocation4 + $0x18] sm:$0xff]  ;;  %v50_v1 = vld [vmem:[#allocation4 + $0x10] sm:$0xff]  ;;  %vm56_vm0 = vcmask 261120   ;;  %vm86_vm1 = vcmask 785408  }
   0xc   :  { %75 = vmatpush.msra.mxu0 %v51_v0  ;;  %97 = vmatpush.msra.mxu1 %v51_v0  ;;  %v49_v2 = vld [vmem:[#allocation4 + $0x8] sm:$0xff]  ;;  %v48_v3 = vld [vmem:[#allocation4] sm:$0xff]  ;;  %v46_v4 = vld [vmem:[#allocation2] sm:$0xff] }
   0xd   :  { %v47_v5 = vld [vmem:[#allocation2 + $0x8] sm:$0xff]  ;;  %v105_v6 = vld [vmem:[%s199_s2] ss:$0 sm:$0xff] }
   0xe   :  { %76 = vmatpush.msra.mxu0 %v50_v1  ;;  %98 = vmatpush.msra.mxu1 %v50_v1 }
  0x10   :  { %77 = vmatpush.msra.mxu0 %v49_v2  ;;  %99 = vmatpush.msra.mxu1 %v49_v2 }
  0x12   :  { %78 = vmatpush.msra.mxu0 %v48_v3  ;;  %100 = vmatpush.msra.mxu1 %v48_v3 }
  0x13   :  { %95 = vmatmul.msk.f32.vlgmr.msra.gmra.mxu0 %vm56_vm0, %v46_v4  ;;  %96 = vmatmul.msk.f32.vlgmr.msra.gmra.mxu1 %vm56_vm0, %v47_v5 }
  0x90   :  { %v80_v7 = vpop.f32.mrf.mxu0  ;;  %v83_v8 = vpop.f32.mrf.mxu1 }
  0x91   :  { %v81_v9 = vadd.f32 %v105_v6, %v80_v7  ;;  %v84_v10 = vadd.f32 %v105_v6, %v83_v8 }
  0x93   :  { %87 = vst.msk [vmem:[%s200_s3] sm:$0xff] %vm86_vm1, %v81_v9 }
  0x94   :  { %88 = vst.msk [vmem:[%s200_s3 + $0x8] sm:$0xff] %vm86_vm1, %v84_v10 }
  0x95   :  { %93 = vsyncpa [#allocation3], 1 }
  0x96   :  { %94 = vsyncpa [#allocation5], 1 }

// kernel: attention_forward.4
= control target key start
LH: loop header
LB: loop body
LE: loop exit
PB: predicated region body
PF: predicated region fallthrough
CT: control target
= control target key end

     0   :  { %s728_s12 = smov 0   ;;  %s730_s13 = smov 0   ;;  %s803_s0 = inlined_call_operand.vmem [shape: f32[2,4,8,8], index: 0, kind: input, shape index: {}]   ;;  %s804_s1 = inlined_call_operand.vmem [shape: f32[2,4,8,8], index: 1, kind: input, shape index: {}]   ;;  %s805_s2 = inlined_call_operand.vmem [shape: f32[2,4,8,8], index: 2, kind: input, shape index: {}]   ;;  %s806_s3 = inlined_call_operand.vmem [shape: f32[2,4,8,8], index: 3, kind: output, shape index: {}]  }
   0x1   :  { %s732_s14 = smov 0   ;;  %s734_s15 = smov 0  }
   0x2   :  { %s736_s16 = smov 0  }
   0x3 LB: > { %s35_s17 = sadd.s32 1, %s695_s14  ;;  %s39_s18 = sadd.s32 1, %s699_s15  ;;  %s703_s16 = sphi %s736_s16, %s13_s16   ;;  %s699_s15 = sphi %s734_s15, %s810_s15   ;;  %s695_s14 = sphi %s732_s14, %s809_s14   ;;  %s691_s13 = sphi %s730_s13, %s808_s13   ;;  %s687_s12 = sphi %s728_s12, %s807_s12  }
   0x4   : > { %p37_p0 = scmp.ge.s32.totalorder %s35_s17, 4  ;;  %p599_p1 = scmp.ge.s32.totalorder %s703_s16, 1 }
   0x5   : > { %p217_p2 = scmp.lt.s32.totalorder %s703_s16, 9 }
   0x6   : > { %s812_s17 = smov (%p37_p0, %s35_s17), 0  ;;  %s814_s18 = smov (!%p37_p0, %s39_s18), %s699_s15 }
   0x7   : > { %p218_p3 = pnand %p599_p1, %p217_p2  ;;  %p41_p4 = scmp.ge.s32.totalorder %s814_s18, 2 }
   0x8   : > { %p275_p5 = scmp.lt.s32.totalorder (!%p218_p3), %s691_s13, 1  ;;  %p277_p6 = scmp.lt.s32.totalorder (!%p218_p3), %s687_s12, 3 }
   0x9   : > { %s816_s18 = smov (%p41_p4, %s814_s18), 0  ;;  %221 = sbr.rel (%p218_p3) target bundleno = 623 (0x26f), region = 32 }
   0xe   : > { %s818_s13 = smov (!%p275_p5, %s691_s13), 1  ;;  %s820_s12 = smov (!%p277_p6, %s687_s12), 3  ;;  %vm326_vm0 = vcmask 64512   ;;  %vm323_vm1 = vcmask 7168   ;;  %v705_v3 = vmov -1e+30   ;;  %v367_v4 = vlaneseq }
   0xf   : > { %s600_s19 = sshll.u32 %s818_s13, 2  ;;  %324 = vst.msk [vmem:[#allocation2] sm:$0xff] %vm323_vm1, %v705_v3  ;;  %v706_v10 = vmov 0   ;;  %v707_v11 = vmov 0.0  }
  0x10   : > { %s283_s20 = sadd.s32 %s600_s19, %s820_s12  ;;  %v368_v5 = vshrl.u32 %v367_v4, 7  ;;  %v372_v6 = vand.u32 127, %v367_v4  ;;  %656 = vset.pattern.permute.xlu0 %v706_v10  ;;  %657 = vset.pattern.permute.xlu1 %v706_v10  ;;  %325 = vst.msk [vmem:[#allocation3] sm:$0xff] %vm323_vm1, %v707_v11 }
  0x11   : > { %s758_s21 = sshll.u32 %s283_s20, 3  ;;  %658 = vset.pattern.permute.xlu2 %v706_v10  ;;  %327 = vst.msk [vmem:[#allocation4] sm:$0xff] %vm326_vm0, %v707_v11 }
  0x12   : > { %s296_s24 = scalar_lea.vmem %s804_s1, %s758_s21  ;;  %s285_s27 = scalar_lea.vmem %s803_s0, %s758_s21  ;;  %vm375_vm2 = vcmp.ge.s32.totalorder %v368_v5, %v372_v6 }
  0x13   : > { %v337_v0 = vld [vmem:[%s296_s24] sm:$0xff]  ;;  %s307_s30 = scalar_lea.vmem %s805_s2, %s758_s21  ;;  %s318_s6 = scalar_lea.vmem %s806_s3, %s758_s21 }
  0x14   : > { %v335_v1 = vld [vmem:[%s285_s27] sm:$0xff]  ;;  %608 = vmatpush.xpose.msk.msra.mxu0 %vm326_vm0, %v337_v0 }
  0x15   : > { %v336_v2 = vmul.f32 0.35355338, %v335_v1  ;;  %v338_v16 = vld [vmem:[%s307_s30] sm:$0xff] }
  0x16   : > { %v377_v12 = vld [vmem:[#allocation2] sm:$0xff]  ;;  %426 = vmatpush.msra.mxu1 %v338_v16 }
  0x17   : > { %609 = vmatmul.msk.f32.vlgmr.msra.gmra.mxu0 %vm326_vm0, %v336_v2  ;;  %v393_v24 = vld [vmem:[#allocation3] sm:$0xff] }
  0x18   : > { %v401_v30 = vld [vmem:[#allocation4] sm:$0xff] }
  0x94   : > { %v363_v7 = vpop.f32.mrf.mxu0 }
  0x95   : > { %v376_v8 = vsel %vm375_vm2, %v363_v7, -1e+30 }
  0x96   : > { %v378_v9 = vsel %vm326_vm0, %v376_v8, -inf }
  0x97   : > { %379 = vmax.xlane.f32.xlu0 %v378_v9 }
 0x10a   : > { %v380_v13 = vpop.xlane.xlu0 %379 }
 0x10b   : > { %v381_v14 = vmax.f32 %v377_v12, %v380_v13 }
 0x10d   : > { %v382_v15 = vsub.f32 %v377_v12, %v381_v14  ;;  %433 = vst.msk [vmem:[#allocation2] sm:$0xff] %vm323_vm1, %v381_v14  ;;  %387 = vperm.xlu0 %656, %v381_v14  }
 0x10f   : > { %v383_v22 = vmul.f32 1.442695, %v382_v15 }
 0x17f   : > { %v388_v17 = vpop.permute.xlu0 %387 }
 0x180   : > { %v390_v18 = vsub.f32 %v376_v8, %v388_v17 }
 0x182   : > { %v391_v19 = vmul.f32 1.442695, %v390_v18 }
 0x184   : > { %659 = vpow2.f32 %v391_v19 }
 0x185   : > { %661 = vpow2.f32 %v383_v22 }
 0x18a   : > { %v660_v20 = vpop.eup %659 }
 0x18b   : > { %610 = vmatmul.msk.f32.vlgmr.msra.gmra.mxu1 %vm326_vm0, %v660_v20  ;;  %v395_v21 = vsel %vm326_vm0, %v660_v20, 0.0  ;;  %v662_v23 = vpop.eup %661 }
 0x18c   : > { %396 = vadd.xlane.f32.xlu1 %v395_v21  ;;  %v394_v25 = vmul.f32 %v662_v23, %v393_v24 }
 0x1a5   : > { %404 = vperm.xlu1 %657, %v662_v23  }
 0x1ff   : > { %v397_v26 = vpop.xlane.xlu1 %396 }
 0x200   : > { %v398_v27 = vadd.f32 %v397_v26, %v394_v25 }
 0x202   : > { %400 = vst.msk [vmem:[#allocation3] sm:$0xff] %vm323_vm1, %v398_v27 }
 0x208   : > { %v428_v33 = vpop.f32.mrf.mxu1 }
 0x209   : > { %v437_v28 = vld [vmem:[#allocation3] sm:$0xff] }
 0x20a   : > { %663 = vrcp.f32 %v437_v28 }
 0x210   : > { %v664_v29 = vpop.eup %663 }
 0x211   : > { %442 = vperm.xlu2 %658, %v664_v29  }
 0x217   : > { %v405_v31 = vpop.permute.xlu1 %404 }
 0x218   : > { %v407_v32 = vmul.f32 %v405_v31, %v401_v30 }
 0x21a   : > { %v431_v34 = vadd.f32 %v428_v33, %v407_v32 }
 0x21c   : > { %432 = vst.msk [vmem:[#allocation4] sm:$0xff] %vm326_vm0, %v431_v34 }
 0x223   : > { %v439_v35 = vld [vmem:[#allocation4] sm:$0xff] }
 0x26b   : > { %v443_v36 = vpop.permute.xlu2 %442 }
 0x26c   : > { %v445_v37 = vmul.f32 %v443_v36, %v439_v35 }
 0x26e   : > { %447 = vst.msk [vmem:[%s318_s6] sm:$0xff] %vm326_vm0, %v445_v37 }
 0x26f PF: > { %s13_s16 = sadd.s32 1, %s703_s16   ;;  %s807_s12 = smov %s695_s14 }
 0x270   : > { %p10_p7 = scmp.ge.s32.totalorder %s13_s16, 10   ;;  %s808_s13 = smov %s699_s15 }
 0x271   : > { %s809_s14 = smov %s812_s17  ;;  %s810_s15 = smov %s816_s18 }
 0x272   :  { %12 = sbr.rel (!%p10_p7) target bundleno = 3 (0x3), region = 80 }

</bundles_post_ra>
